<compile_context>
chip_gen: v7x
topology: tpu7x:2x2x1
jax: 0.10.0
libtpu: 0.0.40
codegen_flags: <defaults>
</compile_context>

<pallas_src>
import jax
import jax.numpy as jnp
from jax.experimental import pallas as pl
from jax.experimental.pallas import tpu as pltpu

OBS_DIM = 32        # observation feature size
HIDDEN = 64         # agent hidden width
NUM_ACTIONS = 8     # size of the action distribution
LANES = 128         # lane width of every VMEM tile

# Fused lane-dense input slab (f32): lanes [0,32)=obs, [32,40)=gumbel, rest 0.
_IN_OBS = 0
_IN_GUMBEL = OBS_DIM

# bf16 packed weight buffer (rows; 128 lanes wide):
_ROW_W1 = 0                       # rows [0, 32):   w1 in lanes [0, 64)
_ROW_W2 = OBS_DIM                 # rows [32, 160): fused head [w2 | wv | 0]
_W_ROWS = _ROW_W2 + LANES         # 160 rows = 10 * 16-row bf16 sublane tiles

# f32 bias buffer (8, 128): row 0 = b1 (lanes [0,64)), row 1 = [b2 | bv | 0].
_B_ROWS = 8

# Output slab layout (lanes of the (TB, 128) f32 output):
_O_PROBS = 0                            # lanes [0, 8)   action_probs
_O_LOGP = NUM_ACTIONS                   # lanes [8, 16)  log_probs
_O_LOGP_SEL = 2 * NUM_ACTIONS           # lane 16        log_prob of sampled action
_O_VALUE = 2 * NUM_ACTIONS + 1          # lane 17        value head (the discarded `_`)
_O_ACTION = 2 * NUM_ACTIONS + 2         # lane 18        sampled action index (as f32)
_O_PAD = LANES - (_O_ACTION + 1)        # zero padding to 128 lanes


def _policy_kernel(xg_ref, w_ref, b_ref, out_ref):
    # xg_ref: (TB, 128) f32 fused [obs | gumbel | 0] slab
    # w_ref:  (160, 128) bf16 packed weights (VMEM-resident across the grid)
    # b_ref:  (8, 128)   f32 biases          (VMEM-resident across the grid)
    # out_ref:(TB, 128)  f32 lane-dense output slab
    xg = xg_ref[...]                                               # one input load
    x = xg[:, _IN_OBS:_IN_OBS + OBS_DIM].astype(jnp.bfloat16)      # (TB, 32)
    gumbel = xg[:, _IN_GUMBEL:_IN_GUMBEL + NUM_ACTIONS]            # (TB, 8)

    w1 = w_ref[_ROW_W1:_ROW_W1 + OBS_DIM, :]                       # (32, 128) bf16
    w2 = w_ref[_ROW_W2:_ROW_W2 + LANES, :]                         # (128,128) bf16
    b1 = b_ref[0:1, :]                                             # (1, 128) f32
    b2 = b_ref[1:2, :]                                             # (1, 128) f32

    # Hidden layer.  Invariant: w1 lanes [HIDDEN,128) and b1 lanes [HIDDEN,128)
    # are zero, so h lanes [HIDDEN,128) are exactly zero after ReLU and the
    # fused-head matmul below is unaffected by padding.
    h = jnp.dot(x, w1, preferred_element_type=jnp.float32) + b1    # (TB, 128)
    h = jnp.maximum(h, 0.0)

    # Fused action-score + value head in one MXU pass
    # (w2 columns 0..7 = action head, column 8 = value head, rest zero).
    heads = jnp.dot(h.astype(jnp.bfloat16), w2,
                    preferred_element_type=jnp.float32) + b2       # (TB, 128)
    scores = heads[:, 0:NUM_ACTIONS]                               # (TB, A)
    value = heads[:, NUM_ACTIONS:NUM_ACTIONS + 1]                  # (TB, 1)

    # softmax / log-softmax over the action dimension.
    m = jnp.max(scores, axis=-1, keepdims=True)
    z = scores - m
    e = jnp.exp(z)
    s = jnp.sum(e, axis=-1, keepdims=True)
    probs = e / s
    logp = z - jnp.log(s)

    # Categorical sample via Gumbel-max; argmax + log_prob gather in-kernel.
    pert = logp + gumbel
    mx = jnp.max(pert, axis=-1, keepdims=True)
    lane = jax.lax.broadcasted_iota(jnp.int32, pert.shape, 1).astype(jnp.float32)
    action_f = jnp.min(jnp.where(pert >= mx, lane, jnp.float32(NUM_ACTIONS)),
                       axis=-1, keepdims=True)                     # first argmax
    action_f = jnp.minimum(action_f, jnp.float32(NUM_ACTIONS - 1)) # NaN-safe clamp
    sel = lane == action_f
    logp_sel = jnp.sum(jnp.where(sel, logp, 0.0), axis=-1, keepdims=True)

    # Assemble the full slab in registers and issue ONE unmasked 128-lane store.
    pad = jnp.zeros((probs.shape[0], _O_PAD), jnp.float32)
    out_ref[...] = jnp.concatenate(
        [probs, logp, logp_sel, value, action_f, pad], axis=1)


def _round_up(n, m):
    return ((n + m - 1) // m) * m


def _choose_tile(b):
    """Pick the observation tile: few fat grid steps, >=2 steps when possible."""
    b8 = _round_up(max(b, 1), 8)
    if b8 <= 8:
        return 8
    if b8 >= 512:
        # Fat MXU-aligned tiles (multiple of 256), grid >= 2 for v7x megacore.
        return min(_round_up(pl.cdiv(b8, 2), 256), 512)
    # Moderate batch: split into two steps so both v7x TensorCores get work.
    return _round_up(pl.cdiv(b8, 2), 8)


def _run_policy(w_packed, b_packed, xg, tb):
    """xg: (B, 128) fused [obs | gumbel] slab; B must be a multiple of tb."""
    b = xg.shape[0]
    slab = pl.pallas_call(
        _policy_kernel,
        out_shape=jax.ShapeDtypeStruct((b, LANES), jnp.float32),
        grid=(b // tb,),
        in_specs=[
            pl.BlockSpec((tb, LANES), lambda i: (i, 0)),
            # Constant index maps: Mosaic keeps the packed params VMEM-resident
            # across all grid steps (single DMA, no per-step re-fetch).
            pl.BlockSpec((_W_ROWS, LANES), lambda i: (0, 0)),
            pl.BlockSpec((_B_ROWS, LANES), lambda i: (0, 0)),
        ],
        out_specs=pl.BlockSpec((tb, LANES), lambda i: (i, 0)),
        compiler_params=pltpu.CompilerParams(
            dimension_semantics=("parallel",)),
    )(xg, w_packed, b_packed)
    probs = slab[:, _O_PROBS:_O_PROBS + NUM_ACTIONS]
    logp = slab[:, _O_LOGP:_O_LOGP + NUM_ACTIONS]
    logp_sel = slab[:, _O_LOGP_SEL]
    value = slab[:, _O_VALUE]
    action = slab[:, _O_ACTION].astype(jnp.int32)
    return action, logp_sel, probs, logp, value


@jax.jit
def policy_forward(w_packed, b_packed, observation, key):
    """Single-observation Policy.forward: unsqueeze(0), agent, softmax, sample."""
    state = observation.astype(jnp.float32).reshape(1, OBS_DIM)    # unsqueeze(0)
    gumbel = jax.random.gumbel(key, (1, NUM_ACTIONS), jnp.float32)
    tb = 8                                                          # one sublane tile
    xg = jnp.zeros((tb, LANES), jnp.float32)
    xg = xg.at[:, _IN_OBS:_IN_OBS + OBS_DIM].set(jnp.broadcast_to(state, (tb, OBS_DIM)))
    xg = xg.at[:, _IN_GUMBEL:_IN_GUMBEL + NUM_ACTIONS].set(
        jnp.broadcast_to(gumbel, (tb, NUM_ACTIONS)))
    action, logp_sel, probs, _logp, value = _run_policy(w_packed, b_packed, xg, tb)
    return action[0], logp_sel[0], probs[0], value[0]


@jax.jit
def policy_forward_batch(w_packed, b_packed, observations, key):
    """Batched rollout path: fat tiles, <= 2 grid steps for moderate batches."""
    b = observations.shape[0]
    tb = _choose_tile(b)
    b_pad = _round_up(b, tb)
    gumbel = jax.random.gumbel(key, (b_pad, NUM_ACTIONS), jnp.float32)
    xg = jnp.zeros((b_pad, LANES), jnp.float32)
    xg = xg.at[:b, _IN_OBS:_IN_OBS + OBS_DIM].set(observations.astype(jnp.float32))
    xg = xg.at[:, _IN_GUMBEL:_IN_GUMBEL + NUM_ACTIONS].set(gumbel)
    action, logp_sel, probs, logp, value = _run_policy(w_packed, b_packed, xg, tb)
    return action[:b], logp_sel[:b], probs[:b], logp[:b], value[:b]


def _init_agent_params(key):
    k1, k2, k3 = jax.random.split(key, 3)
    s1 = 1.0 / jnp.sqrt(jnp.float32(OBS_DIM))
    s2 = 1.0 / jnp.sqrt(jnp.float32(HIDDEN))
    return {
        "w1": jax.random.normal(k1, (OBS_DIM, HIDDEN), jnp.float32) * s1,
        "b1": jnp.zeros((HIDDEN,), jnp.float32),
        "w2": jax.random.normal(k2, (HIDDEN, NUM_ACTIONS), jnp.float32) * s2,
        "b2": jnp.zeros((NUM_ACTIONS,), jnp.float32),
        "wv": jax.random.normal(k3, (HIDDEN, 1), jnp.float32) * s2,
        "bv": jnp.zeros((1,), jnp.float32),
    }


def pack_params(params):
    """Pack weights into one bf16 (160,128) buffer and biases into f32 (8,128)."""
    w = jnp.zeros((_W_ROWS, LANES), jnp.bfloat16)
    w = w.at[_ROW_W1:_ROW_W1 + OBS_DIM, 0:HIDDEN].set(
        params["w1"].astype(jnp.bfloat16))
    w = w.at[_ROW_W2:_ROW_W2 + HIDDEN, 0:NUM_ACTIONS].set(
        params["w2"].astype(jnp.bfloat16))
    w = w.at[_ROW_W2:_ROW_W2 + HIDDEN, NUM_ACTIONS].set(
        params["wv"][:, 0].astype(jnp.bfloat16))
    bias = jnp.zeros((_B_ROWS, LANES), jnp.float32)
    bias = bias.at[0, 0:HIDDEN].set(params["b1"])
    bias = bias.at[1, 0:NUM_ACTIONS].set(params["b2"])
    bias = bias.at[1, NUM_ACTIONS].set(params["bv"][0])
    return w, bias


def _reference_agent(params, obs):
    """Pure-JAX reference with the same bf16-input / f32-accumulate matmuls."""
    bf = jnp.bfloat16
    w1 = params["w1"].astype(bf)
    w2 = params["w2"].astype(bf)
    wv = params["wv"].astype(bf)
    x = obs.astype(jnp.float32).astype(bf)
    h = jnp.maximum(
        jnp.dot(x, w1, preferred_element_type=jnp.float32) + params["b1"], 0.0)
    hb = h.astype(bf)
    scores = jnp.dot(hb, w2, preferred_element_type=jnp.float32) + params["b2"]
    value = jnp.dot(hb, wv, preferred_element_type=jnp.float32) + params["bv"]
    probs = jax.nn.softmax(scores, axis=-1)
    logp = jax.nn.log_softmax(scores, axis=-1)
    return probs, logp, value[:, 0]


class Policy:
    """Thin Python mirror of the torch module (bookkeeping only)."""

    def __init__(self, params, seed=1234):
        self.w_packed, self.b_packed = pack_params(params)
        self.saved_log_probs = []
        self.rewards = []
        self._key = jax.random.PRNGKey(seed)

    def forward(self, observation):
        self._key, sub = jax.random.split(self._key)
        action, log_prob, _probs, _value = policy_forward(
            self.w_packed, self.b_packed, jnp.asarray(observation), sub)
        self.saved_log_probs.append(log_prob)
        # TODO(synk): torch's `.item()` / cuda device selection is host glue;
        # int() forces a device->host sync per env step — prefer
        # policy_forward_batch (vectorized envs) or keep actions on-device.
        return int(action)


if __name__ == "__main__":
    key = jax.random.PRNGKey(0)
    k_param, k_obs, k_batch, k_gumbel = jax.random.split(key, 4)

    params = _init_agent_params(k_param)
    w_packed, b_packed = pack_params(params)

    # Single-step Policy.forward (matches the torch module's call pattern).
    observation = jax.random.normal(k_obs, (OBS_DIM,), dtype=jnp.float32)
    policy = Policy(params)
    action = policy.forward(observation)
    assert 0 <= action < NUM_ACTIONS
    assert len(policy.saved_log_probs) == 1

    # Batched rollout path: two fat grid steps, weights resident across the grid.
    B = 64
    obs_batch = jax.random.normal(k_batch, (B, OBS_DIM), dtype=jnp.float32)
    act_b, logp_sel_b, probs_b, logp_b, value_b = policy_forward_batch(
        w_packed, b_packed, obs_batch, k_gumbel)
    jax.block_until_ready((act_b, logp_sel_b, probs_b, logp_b, value_b))

    # Correctness vs. pure-JAX reference of the same agent.
    probs_r, logp_r, value_r = _reference_agent(params, obs_batch)
    assert jnp.allclose(probs_b, probs_r, atol=1e-4, rtol=1e-4)
    assert jnp.allclose(logp_b, logp_r, atol=1e-4, rtol=1e-4)
    assert jnp.allclose(value_b, value_r, atol=1e-4, rtol=1e-4)
    assert jnp.allclose(jnp.sum(probs_b, axis=-1), 1.0, atol=1e-5)
    assert bool(jnp.all((act_b >= 0) & (act_b < NUM_ACTIONS)))
    gathered = jnp.take_along_axis(logp_b, act_b[:, None], axis=1)[:, 0]
    assert jnp.allclose(logp_sel_b, gathered, atol=1e-6)

    print("KERNEL_OK")
</pallas_src>

<mosaic_0001>
module attributes {stable_mosaic.version = 11 : i64} {
  func.func @_policy_kernel(%arg0: i32, %arg1: memref<8x128xf32, #tpu.memory_space<vmem>>, %arg2: memref<160x128xbf16, #tpu.memory_space<vmem>>, %arg3: memref<8x128xf32, #tpu.memory_space<vmem>>, %arg4: memref<8x128xf32, #tpu.memory_space<vmem>>) attributes {dimension_semantics = [#tpu.dimension_semantics<parallel>], iteration_bounds = array<i64: 1>, scalar_prefetch = 0 : i64, scratch_operands = 0 : i64, tpu.core_type = #tpu.core_type<tc>, window_params = [{transform_indices = @transform_0, window_bounds = array<i64: 8, 128>}, {pipeline_mode = #tpu.pipeline_mode<synchronous>, transform_indices = @transform_1, window_bounds = array<i64: 160, 128>}, {pipeline_mode = #tpu.pipeline_mode<synchronous>, transform_indices = @transform_2, window_bounds = array<i64: 8, 128>}, {transform_indices = @transform_3, window_bounds = array<i64: 8, 128>}]} {
    %c0 = arith.constant 0 : index
    %c0_0 = arith.constant 0 : index
    %0 = vector.load %arg1[%c0, %c0_0] : memref<8x128xf32, #tpu.memory_space<vmem>>, vector<8x128xf32>
    %1 = vector.extract_strided_slice %0 {offsets = [0, 0], sizes = [8, 32], strides = [1, 1]} : vector<8x128xf32> to vector<8x32xf32>
    %2 = arith.truncf %1 : vector<8x32xf32> to vector<8x32xbf16>
    %3 = vector.extract_strided_slice %0 {offsets = [0, 32], sizes = [8, 8], strides = [1, 1]} : vector<8x128xf32> to vector<8x8xf32>
    %c0_1 = arith.constant 0 : index
    %c0_2 = arith.constant 0 : index
    %4 = vector.load %arg2[%c0_1, %c0_2] : memref<160x128xbf16, #tpu.memory_space<vmem>>, vector<32x128xbf16>
    %c32 = arith.constant 32 : index
    %c0_3 = arith.constant 0 : index
    %5 = vector.load %arg2[%c32, %c0_3] : memref<160x128xbf16, #tpu.memory_space<vmem>>, vector<128x128xbf16>
    %c0_4 = arith.constant 0 : index
    %c0_5 = arith.constant 0 : index
    %6 = vector.load %arg3[%c0_4, %c0_5] : memref<8x128xf32, #tpu.memory_space<vmem>>, vector<1x128xf32>
    %c1 = arith.constant 1 : index
    %c0_6 = arith.constant 0 : index
    %7 = vector.load %arg3[%c1, %c0_6] : memref<8x128xf32, #tpu.memory_space<vmem>>, vector<1x128xf32>
    %cst = arith.constant dense<0.000000e+00> : vector<8x128xf32>
    %8 = tpu.matmul %2, %4, %cst {dimension_numbers = #tpu.dot_dimension_numbers<[1], [0], [0], [1], [0, 0, 1, 1], [], []>} : vector<8x32xbf16>, vector<32x128xbf16>, vector<8x128xf32> -> vector<8x128xf32>
    %9 = vector.broadcast %6 : vector<1x128xf32> to vector<8x128xf32>
    %10 = arith.addf %8, %9 : vector<8x128xf32>
    %cst_7 = arith.constant 0.000000e+00 : f32
    %11 = vector.broadcast %cst_7 : f32 to vector<8x128xf32>
    %12 = arith.maximumf %10, %11 : vector<8x128xf32>
    %13 = arith.truncf %12 : vector<8x128xf32> to vector<8x128xbf16>
    %cst_8 = arith.constant dense<0.000000e+00> : vector<8x128xf32>
    %14 = tpu.matmul %13, %5, %cst_8 {dimension_numbers = #tpu.dot_dimension_numbers<[1], [0], [0], [1], [0, 0, 1, 1], [], []>} : vector<8x128xbf16>, vector<128x128xbf16>, vector<8x128xf32> -> vector<8x128xf32>
    %15 = vector.broadcast %7 : vector<1x128xf32> to vector<8x128xf32>
    %16 = arith.addf %14, %15 : vector<8x128xf32>
    %17 = vector.extract_strided_slice %16 {offsets = [0, 0], sizes = [8, 8], strides = [1, 1]} : vector<8x128xf32> to vector<8x8xf32>
    %18 = vector.extract_strided_slice %16 {offsets = [0, 8], sizes = [8, 1], strides = [1, 1]} : vector<8x128xf32> to vector<8x1xf32>
    %cst_9 = arith.constant dense<0xFF800000> : vector<8xf32>
    %19 = vector.multi_reduction <maximumf>, %17, %cst_9 [1] : vector<8x8xf32> to vector<8xf32>
    %20 = vector.shape_cast %19 : vector<8xf32> to vector<8x1xf32>
    %21 = vector.broadcast %20 : vector<8x1xf32> to vector<8x8xf32>
    %22 = arith.subf %17, %21 : vector<8x8xf32>
    %23 = math.exp %22 : vector<8x8xf32>
    %cst_10 = arith.constant dense<0.000000e+00> : vector<8xf32>
    %24 = vector.multi_reduction <add>, %23, %cst_10 [1] : vector<8x8xf32> to vector<8xf32>
    %25 = vector.shape_cast %24 : vector<8xf32> to vector<8x1xf32>
    %26 = vector.broadcast %25 : vector<8x1xf32> to vector<8x8xf32>
    %27 = arith.divf %23, %26 : vector<8x8xf32>
    %28 = math.log %25 : vector<8x1xf32>
    %29 = vector.broadcast %28 : vector<8x1xf32> to vector<8x8xf32>
    %30 = arith.subf %22, %29 : vector<8x8xf32>
    %31 = arith.addf %30, %3 : vector<8x8xf32>
    %cst_11 = arith.constant dense<0xFF800000> : vector<8xf32>
    %32 = vector.multi_reduction <maximumf>, %31, %cst_11 [1] : vector<8x8xf32> to vector<8xf32>
    %33 = vector.shape_cast %32 : vector<8xf32> to vector<8x1xf32>
    %34 = tpu.iota {dimensions = array<i32: 1>} : vector<8x8xi32>
    %35 = arith.sitofp %34 : vector<8x8xi32> to vector<8x8xf32>
    %36 = vector.broadcast %33 : vector<8x1xf32> to vector<8x8xf32>
    %37 = arith.cmpf oge, %31, %36 : vector<8x8xf32>
    %cst_12 = arith.constant 8.000000e+00 : f32
    %38 = vector.broadcast %cst_12 : f32 to vector<8x8xf32>
    %39 = arith.select %37, %35, %38 : vector<8x8xi1>, vector<8x8xf32>
    %cst_13 = arith.constant dense<0x7F800000> : vector<8xf32>
    %40 = vector.multi_reduction <minimumf>, %39, %cst_13 [1] : vector<8x8xf32> to vector<8xf32>
    %41 = vector.shape_cast %40 : vector<8xf32> to vector<8x1xf32>
    %cst_14 = arith.constant 7.000000e+00 : f32
    %42 = vector.broadcast %cst_14 : f32 to vector<8x1xf32>
    %43 = arith.minimumf %41, %42 : vector<8x1xf32>
    %44 = vector.broadcast %43 : vector<8x1xf32> to vector<8x8xf32>
    %45 = arith.cmpf oeq, %35, %44 : vector<8x8xf32>
    %cst_15 = arith.constant 0.000000e+00 : f32
    %46 = vector.broadcast %cst_15 : f32 to vector<8x8xf32>
    %47 = arith.select %45, %30, %46 : vector<8x8xi1>, vector<8x8xf32>
    %cst_16 = arith.constant dense<0.000000e+00> : vector<8xf32>
    %48 = vector.multi_reduction <add>, %47, %cst_16 [1] : vector<8x8xf32> to vector<8xf32>
    %49 = vector.shape_cast %48 : vector<8xf32> to vector<8x1xf32>
    %cst_17 = arith.constant 0.000000e+00 : f32
    %50 = vector.broadcast %cst_17 : f32 to vector<8x109xf32>
    %51 = tpu.concatenate %27, %30, %49, %18, %43, %50 in 1 : vector<8x8xf32>, vector<8x8xf32>, vector<8x1xf32>, vector<8x1xf32>, vector<8x1xf32>, vector<8x109xf32> -> vector<8x128xf32>
    %c0_18 = arith.constant 0 : index
    %c0_19 = arith.constant 0 : index
    %52 = vector.load %arg4[%c0_18, %c0_19] : memref<8x128xf32, #tpu.memory_space<vmem>>, vector<8x128xf32>
    tpu.vector_store %arg4[%c0_18, %c0_19], %51 {strides = array<i32>} : memref<8x128xf32, #tpu.memory_space<vmem>>, vector<8x128xf32>,
    return
  }
  func.func @transform_0(%arg0: i32) -> (i32, i32) {
    %c0_i32 = arith.constant 0 : i32
    %c0_i32_0 = arith.constant 0 : i32
    return %arg0, %c0_i32 : i32, i32
  }
  func.func @transform_1(%arg0: i32) -> (i32, i32) {
    %c0_i32 = arith.constant 0 : i32
    %c0_i32_0 = arith.constant 0 : i32
    %c0_i32_1 = arith.constant 0 : i32
    return %c0_i32, %c0_i32_0 : i32, i32
  }
  func.func @transform_2(%arg0: i32) -> (i32, i32) {
    %c0_i32 = arith.constant 0 : i32
    %c0_i32_0 = arith.constant 0 : i32
    %c0_i32_1 = arith.constant 0 : i32
    return %c0_i32, %c0_i32_0 : i32, i32
  }
  func.func @transform_3(%arg0: i32) -> (i32, i32) {
    %c0_i32 = arith.constant 0 : i32
    %c0_i32_0 = arith.constant 0 : i32
    return %arg0, %c0_i32 : i32, i32
  }
}

</mosaic_0001>

<bundles_post_ra>
// kernel: policy_forward.1
= control target key start
LH: loop header
LB: loop body
LE: loop exit
PB: predicated region body
PF: predicated region fallthrough
CT: control target
= control target key end

     0   :  { %v326_v0 = vmov 0.0   ;;  %vm327_vm0 = vmmov 0   ;;  %vm55_vm1 = vcmask 261120   ;;  %vm193_vm2 = vcmask 64512   ;;  %s330_s10 = smov 9   ;;  %s399_s1 = inlined_call_operand.vmem [shape: bf16[160,128], index: 1, kind: input, shape index: {}]   ;;  %s400_s0 = inlined_call_operand.vmem [shape: f32[8,128], index: 0, kind: input, shape index: {}]   ;;  %s401_s2 = inlined_call_operand.vmem [shape: f32[8,128], index: 2, kind: input, shape index: {}]   ;;  %s402_s3 = inlined_call_operand.vmem [shape: f32[8,128], index: 3, kind: output, shape index: {}]  }
   0x1   :  { %277 = vmatprep.subr.bf16.mxu0 %v326_v0  ;;  %v310_v1 = vld [vmem:[%s399_s1] sm:$0xff]   ;;  %281 = vmatprep.mubr.msk.bf16.mxu0 %vm327_vm0, %v326_v0  ;;  %v311_v2 = vld [vmem:[%s399_s1 + $0x8] sm:$0xff]   ;;  %v312_v4 = vld [vmem:[%s399_s1 + $0x10] sm:$0xff]   ;;  %v216_v40 = vlaneseq  ;;  %vm239_vm5 = vcmask 130048   ;;  %vm241_vm6 = vcmask 138240   ;;  %vm243_vm7 = vcmask 146432  }
   0x2   :  { %285 = vmatprep.subr.bf16.mxu1 %v326_v0  ;;  %301 = vmatprep.mubr.msk.bf16.mxu1 %vm327_vm0, %v326_v0  ;;  %v15_v3 = vld [vmem:[%s400_s0] sm:$0xff]  ;;  %v313_v6 = vld [vmem:[%s399_s1 + $0x18] sm:$0xff]   ;;  %v315_v8 = vld [vmem:[%s399_s1 + $0x28] sm:$0xff]   ;;  %vm245_vm8 = vcmask 154624  }
   0x3   :  { %278 = vmatpush3.bf16.msra.mxu0 %v310_v1  ;;  %v16_v5 = vpack.c.bf16 %v15_v3, %v15_v3  ;;  %286 = vmatpush3.bf16.msra.mxu1 %v312_v4  ;;  %v314_v7 = vld [vmem:[%s399_s1 + $0x20] sm:$0xff]   ;;  %v316_v9 = vld [vmem:[%s399_s1 + $0x30] sm:$0xff]   ;;  %v317_v10 = vld [vmem:[%s399_s1 + $0x38] sm:$0xff]   ;;  %v217_v41 = vand.u32 127, %v216_v40 }
   0x4   :  { %279 = vmatprep.subr.bf16.mxu0 %v326_v0  ;;  %287 = vmatprep.subr.bf16.mxu1 %v326_v0  ;;  %v318_v11 = vld [vmem:[%s399_s1 + $0x40] sm:$0xff]   ;;  %v319_v12 = vld [vmem:[%s399_s1 + $0x48] sm:$0xff]   ;;  %s328_s1 = smov 96  }
   0x5   :  { %v252_v13 = vld [vmem:[%s401_s2] ss:$0 sm:$0xff]  ;;  %v256_v21 = vld [vmem:[%s401_s2 + $0x1] ss:$0 sm:$0xff]  ;;  %209 = vrot.lane.b32.xlu1 %v15_v3, %s328_s1  ;;  %v218_v42 = vcvt.s32.f32 %v217_v41  ;;  %s329_s2 = smov 8  }
   0x7   :  { %280 = vmatpush3.bf16.msra.mxu0 %v311_v2  ;;  %288 = vmatpush3.bf16.msra.mxu1 %v313_v6 }
   0x8   :  { %289 = vmatprep.subr.bf16.mxu1 %v326_v0 }
   0xa   :  { %282 = vmatmul.mubr.msk.bf16.vlgmr.msra.gmra.mrb[0].mxu0 %vm55_vm1, %v16_v5 }
   0xb   :  { %290 = vmatpush3.bf16.msra.mxu1 %v314_v7 }
   0xc   :  { %291 = vmatprep.subr.bf16.mxu1 %v326_v0 }
   0xf   :  { %292 = vmatpush3.bf16.msra.mxu1 %v315_v8 }
  0x10   :  { %293 = vmatprep.subr.bf16.mxu1 %v326_v0 }
  0x13   :  { %294 = vmatpush3.bf16.msra.mxu1 %v316_v9 }
  0x14   :  { %295 = vmatprep.subr.bf16.mxu1 %v326_v0 }
  0x17   :  { %296 = vmatpush3.bf16.msra.mxu1 %v317_v10 }
  0x18   :  { %297 = vmatprep.subr.bf16.mxu1 %v326_v0 }
  0x1b   :  { %298 = vmatpush3.bf16.msra.mxu1 %v318_v11 }
  0x1c   :  { %299 = vmatprep.subr.bf16.mxu1 %v326_v0 }
  0x1f   :  { %300 = vmatpush3.bf16.msra.mxu1 %v319_v12 }
  0x77   :  { %v210_v36 = vpop.permute.xlu1 %209 }
  0xdd   :  { %v93_v14 = vpop.f32.mrb[0].mxu0 }
  0xde   :  { %v94_v15 = vadd.f32 %v252_v13, %v93_v14  ;;  %v283_v16 = vpop.f32.mrb[1].mxu0 }
  0xdf   :  { %v96_v17 = vpop.f32.mrb[2].mxu0 }
  0xe0   :  { %v99_v18 = vmax.f32 %v94_v15, 0.0  ;;  %v284_v19 = vpop.f32.mrb[3].mxu0 }
  0xe2   :  { %v100_v20 = vpack.c.bf16 %v99_v18, %v99_v18 }
  0xe4   :  { %302 = vmatmul.mubr.bf16.vlgmr.msra.gmra.mrb[0].mxu1 %v100_v20 }
 0x1b7   :  { %v187_v22 = vpop.f32.mrb[0].mxu1 }
 0x1b8   :  { %v188_v23 = vadd.f32 %v256_v21, %v187_v22  ;;  %v303_v24 = vpop.f32.mrb[1].mxu1 }
 0x1b9   :  { %v190_v25 = vpop.f32.mrb[2].mxu1 }
 0x1ba   :  { %v304_v26 = vpop.f32.mrb[3].mxu1  ;;  %v194_v27 = vsel %vm193_vm2, %v188_v23, -inf }
 0x1bb   :  { %195 = vmax.xlane.f32.xlu0 %v194_v27 }
 0x248   :  { %v196_v28 = vpop.xlane.xlu0 %195 }
 0x249   :  { %v197_v29 = vsub.f32 %v188_v23, %v196_v28 }
 0x24b   :  { %v198_v30 = vmul.f32 1.442695, %v197_v29 }
 0x24d   :  { %320 = vpow2.f32 %v198_v30 }
 0x257   :  { %v321_v31 = vpop.eup %320 }
 0x258   :  { %v200_v32 = vsel %vm193_vm2, %v321_v31, 0.0 }
 0x259   :  { %201 = vadd.xlane.f32.xlu0 %v200_v32 }
 0x2e6   :  { %v202_v33 = vpop.xlane.xlu0 %201 }
 0x2e7   :  { %322 = vlog2.f32 %v202_v33 }
 0x2e8   :  { %324 = vrcp.f32 %v202_v33 }
 0x2f1   :  { %v323_v34 = vpop.eup %322 }
 0x2f2   :  { %v206_v35 = vmul.f32 0.6931472, %v323_v34  ;;  %v325_v51 = vpop.eup %324 }
 0x2f3   :  { %v204_v53 = vmul.f32 %v325_v51, %v321_v31 }
 0x2f4   :  { %v207_v37 = vsub.f32 %v197_v29, %v206_v35 }
 0x2f6   :  { %v212_v38 = vadd.f32 %v210_v36, %v207_v37 }
 0x2f8   :  { %v213_v39 = vsel %vm193_vm2, %v212_v38, -inf }
 0x2f9   :  { %214 = vmax.xlane.f32.xlu1 %v213_v39 }
 0x386   :  { %v215_v43 = vpop.xlane.xlu1 %214 }
 0x387   :  { %vm219_vm3 = vcmp.ge.f32.partialorder %v212_v38, %v215_v43 }
 0x388   :  { %v220_v44 = vsel %vm219_vm3, %v218_v42, 8.0 }
 0x389   :  { %v221_v45 = vsel %vm193_vm2, %v220_v44, inf }
 0x38a   :  { %222 = vmin.xlane.f32.xlu0 %v221_v45 }
 0x3a0   :  { %231 = vrot.lane.b32.xlu0 %v207_v37, %s329_s2 }
 0x417   :  { %v223_v46 = vpop.xlane.xlu0 %222 }
 0x418   :  { %v224_v47 = vmin.f32 %v223_v46, 7.0 }
 0x41a   :  { %vm225_vm4 = vcmp.eq.f32.partialorder %v218_v42, %v224_v47 }
 0x41b   :  { %v226_v48 = vsel %vm225_vm4, %v207_v37, 0.0  ;;  %v232_v50 = vpop.permute.xlu0 %231 }
 0x41c   :  { %v227_v49 = vsel %vm193_vm2, %v226_v48, 0.0  ;;  %v238_v54 = vsel %vm193_vm2, %v204_v53, %v232_v50 }
 0x41d   :  { %228 = vadd.xlane.f32.xlu0 %v227_v49 }
 0x433   :  { %235 = vrot.lane.b32.xlu0 %v188_v23, %s330_s10 }
 0x4aa   :  { %v229_v52 = vpop.xlane.xlu0 %228 }
 0x4ab   :  { %v240_v55 = vsel %vm239_vm5, %v238_v54, %v229_v52 }
 0x4ae   :  { %v236_v56 = vpop.permute.xlu0 %235 }
 0x4af   :  { %v242_v57 = vsel %vm241_vm6, %v240_v55, %v236_v56 }
 0x4b0   :  { %v244_v58 = vsel %vm243_vm7, %v242_v57, %v224_v47 }
 0x4b1   :  { %v246_v59 = vsel %vm245_vm8, %v244_v58, 0.0 }
 0x4b2   :  { %247 = vst [vmem:[%s402_s3] sm:$0xff] %v246_v59 }

</bundles_post_ra>
